<compile_context>
chip_gen: v7x
topology: tpu7x:2x2x1
jax: 0.10.0
libtpu: 0.0.40
codegen_flags: <defaults>
</compile_context>

<pallas_src>
import numpy as np
import jax
import jax.numpy as jnp
from jax.experimental import pallas as pl
from jax.experimental.pallas import tpu as pltpu


# ----------------------------------------------------------------------------
# Host-side operator construction ("module parameters")
# ----------------------------------------------------------------------------
def _gaussian_kernel_1d(ksize, sigma):
    """cv2.getGaussianKernel semantics (sigma > 0 path), normalized to sum 1."""
    if sigma <= 0:
        sigma = 0.3 * ((ksize - 1) * 0.5 - 1) + 0.8
    x = np.arange(ksize, dtype=np.float64) - (ksize - 1) / 2.0
    g = np.exp(-(x * x) / (2.0 * sigma * sigma))
    g /= g.sum()
    return g  # float64


def _linear_interp_matrix(out_size, in_size):
    """M (out,in): PyTorch interpolate(mode='linear', align_corners=False),
    i.e. out = M @ in along one axis."""
    scale = in_size / out_size
    dst = np.arange(out_size, dtype=np.float64)
    src = np.maximum((dst + 0.5) * scale - 0.5, 0.0)
    i0 = np.minimum(np.floor(src).astype(np.int64), in_size - 1)
    i1 = np.where(i0 < in_size - 1, i0 + 1, i0)
    l1 = src - i0
    l0 = 1.0 - l1
    M = np.zeros((out_size, in_size), dtype=np.float64)
    rows = np.arange(out_size)
    M[rows, i0] += l0
    M[rows, i1] += l1
    return M


def _valid_conv_matrix(size, g):
    """B (size-K+1, size) with B[i, i+k] = g[k]: y = B @ x is the 'valid' conv."""
    K = g.shape[0]
    Sc = size - K + 1
    B = np.zeros((Sc, size), dtype=np.float64)
    idx = np.arange(Sc)
    for k in range(K):
        B[idx, idx + k] = g[k]
    return B


def _axis_operator(size, g):
    """(trilinear resize back to `size`) o (valid Gaussian conv): (size, size)."""
    Bm = _valid_conv_matrix(size, g)                       # (size-K+1, size)
    Mm = _linear_interp_matrix(size, size - g.shape[0] + 1)  # (size, size-K+1)
    return Mm @ Bm                                          # float64


# ----------------------------------------------------------------------------
# Pallas kernel: two MXU matmuls per grid step
# ----------------------------------------------------------------------------
def _gaussian3d_kernel(x_ref, bd_ref, ahw_ref, o_ref):
    # D-axis smoothing + resize, block-diagonal over the TB volumes in this tile:
    #   (TB*D, TB*D) @ (TB*D, H*W)
    t = jnp.dot(bd_ref[...], x_ref[...], preferred_element_type=jnp.float32)
    # H- and W-axis smoothing + resize along the lane (H*W) axis:
    #   (TB*D, H*W) @ (H*W, H*W)
    o_ref[...] = jnp.dot(t, ahw_ref[...], preferred_element_type=jnp.float32)


def gaussian_3d(x, kernel_size, sigma):
    """Pallas equivalent of Gaussian_3d.forward.  x: (N, C, D, H, W) float32."""
    N, C, D, H, W = x.shape
    # F.conv3d with weight (1,1,K,1,1) and groups=channels requires channels == 1.
    assert C == 1, "Gaussian_3d grouped conv only supports channels == 1"
    K = int(kernel_size[0])
    assert D - K + 1 > 0 and H - K + 1 > 0 and W - K + 1 > 0

    g = _gaussian_kernel_1d(K, float(sigma[0]))

    # Fold conv + resize into one dense operator per axis, then combine the H
    # and W operators into a single lane-axis matrix (right-multiply form).
    a_d = _axis_operator(D, g)                              # (D, D)
    a_h = _axis_operator(H, g)                              # (H, H)
    a_w = _axis_operator(W, g)                              # (W, W)
    # TODO(synk): for large H*W (e.g. >= 64*64) this kron matrix outgrows VMEM
    # (notably v7x's 64 MiB); apply the H and W factors as two separate matmuls there.
    a_hw_right = np.ascontiguousarray(np.kron(a_h, a_w).T).astype(np.float32)  # (H*W, H*W)

    HW = H * W
    B = N * C

    # Batch TB volumes per grid step so the left matmul has ~128 rows, but keep
    # the grid length >= 2 when possible (v7x has 2 TensorCores).
    TB = min(B, max(1, 128 // D))
    if B >= 2 and -(-B // TB) < 2:
        TB = -(-B // 2)
    if TB < B and (TB * D) % 8 != 0:   # sublane-tile safety for multi-block grids
        TB = B
    Bpad = -(-B // TB) * TB
    grid = Bpad // TB
    tile_rows = TB * D

    # Block-diagonal D operator for a whole tile of TB volumes.
    bd = np.kron(np.eye(TB), a_d).astype(np.float32)        # (TB*D, TB*D)

    # Lane-dense layout: rows = (volume, d), lanes = h*W + w.
    xb = x.reshape(B * D, HW).astype(jnp.float32)
    if Bpad != B:
        xb = jnp.pad(xb, ((0, (Bpad - B) * D), (0, 0)))

    tile_bytes = tile_rows * HW * 4
    vmem_limit = int(min(
        4 * tile_bytes + 2 * (a_hw_right.nbytes + bd.nbytes) + (4 << 20),
        100 * 1024 * 1024))

    out = pl.pallas_call(
        _gaussian3d_kernel,
        out_shape=jax.ShapeDtypeStruct((Bpad * D, HW), jnp.float32),
        grid_spec=pltpu.PrefetchScalarGridSpec(
            num_scalar_prefetch=0,
            grid=(grid,),
            in_specs=[
                pl.BlockSpec((tile_rows, HW), lambda b: (b, 0)),         # input tile
                pl.BlockSpec((tile_rows, tile_rows), lambda b: (0, 0)),  # D operator
                pl.BlockSpec((HW, HW), lambda b: (0, 0)),                # H/W operator
            ],
            out_specs=pl.BlockSpec((tile_rows, HW), lambda b: (b, 0)),
        ),
        compiler_params=pltpu.CompilerParams(
            dimension_semantics=("parallel",),
            vmem_limit_bytes=vmem_limit,
        ),
    )(xb, jnp.asarray(bd), jnp.asarray(a_hw_right))

    return out[:B * D].reshape(N, C, D, H, W)


if __name__ == "__main__":
    key = jax.random.PRNGKey(0)
    N, C, D, H, W = 2, 1, 16, 16, 16
    kernel_size = (5, 5, 5)
    sigma = (1.5, 1.5, 1.5)

    x = jax.random.normal(key, (N, C, D, H, W), dtype=jnp.float32)
    out = jax.block_until_ready(gaussian_3d(x, kernel_size, sigma))
    assert out.shape == (N, C, D, H, W)
    assert out.dtype == jnp.float32

    # Reference: apply the same per-axis linear operators directly (checks the
    # kron / block-diagonal assembly and the Pallas plumbing).
    g = _gaussian_kernel_1d(kernel_size[0], float(sigma[0]))
    a_d = _axis_operator(D, g)
    a_h = _axis_operator(H, g)
    a_w = _axis_operator(W, g)
    ref = np.einsum('ad,bh,cw,nkdhw->nkabc',
                    a_d, a_h, a_w, np.asarray(x, dtype=np.float64))
    assert np.allclose(np.asarray(out), ref, atol=1e-4), \
        float(np.abs(np.asarray(out) - ref).max())

    # Sanity check: a constant volume is invariant under normalized Gaussian
    # smoothing + trilinear interpolation.
    xc = jnp.full((1, 1, D, H, W), 3.25, dtype=jnp.float32)
    oc = jax.block_until_ready(gaussian_3d(xc, kernel_size, sigma))
    assert np.allclose(np.asarray(oc), 3.25, atol=1e-4)

    print("KERNEL_OK")
</pallas_src>

<mosaic_0001>
module attributes {stable_mosaic.version = 11 : i64} {
  func.func @_gaussian3d_kernel(%arg0: i32, %arg1: memref<16x256xf32, #tpu.memory_space<vmem>>, %arg2: memref<16x16xf32, #tpu.memory_space<vmem>>, %arg3: memref<256x256xf32, #tpu.memory_space<vmem>>, %arg4: memref<16x256xf32, #tpu.memory_space<vmem>>) attributes {dimension_semantics = [#tpu.dimension_semantics<parallel>], iteration_bounds = array<i64: 2>, scalar_prefetch = 0 : i64, scratch_operands = 0 : i64, tpu.core_type = #tpu.core_type<tc>, window_params = [{transform_indices = @transform_0, window_bounds = array<i64: 16, 256>}, {pipeline_mode = #tpu.pipeline_mode<synchronous>, transform_indices = @transform_1, window_bounds = array<i64: 16, 16>}, {pipeline_mode = #tpu.pipeline_mode<synchronous>, transform_indices = @transform_2, window_bounds = array<i64: 256, 256>}, {transform_indices = @transform_3, window_bounds = array<i64: 16, 256>}]} {
    %c0 = arith.constant 0 : index
    %c0_0 = arith.constant 0 : index
    %0 = vector.load %arg2[%c0, %c0_0] : memref<16x16xf32, #tpu.memory_space<vmem>>, vector<16x16xf32>
    %c0_1 = arith.constant 0 : index
    %c0_2 = arith.constant 0 : index
    %1 = vector.load %arg1[%c0_1, %c0_2] : memref<16x256xf32, #tpu.memory_space<vmem>>, vector<16x256xf32>
    %cst = arith.constant dense<0.000000e+00> : vector<16x256xf32>
    %2 = tpu.matmul %0, %1, %cst {dimension_numbers = #tpu.dot_dimension_numbers<[1], [0], [0], [1], [0, 0, 1, 1], [], []>} : vector<16x16xf32>, vector<16x256xf32>, vector<16x256xf32> -> vector<16x256xf32>
    %c0_3 = arith.constant 0 : index
    %c0_4 = arith.constant 0 : index
    %3 = vector.load %arg3[%c0_3, %c0_4] : memref<256x256xf32, #tpu.memory_space<vmem>>, vector<256x256xf32>
    %cst_5 = arith.constant dense<0.000000e+00> : vector<16x256xf32>
    %4 = tpu.matmul %2, %3, %cst_5 {dimension_numbers = #tpu.dot_dimension_numbers<[1], [0], [0], [1], [0, 0, 1, 1], [], []>} : vector<16x256xf32>, vector<256x256xf32>, vector<16x256xf32> -> vector<16x256xf32>
    %c0_6 = arith.constant 0 : index
    %c0_7 = arith.constant 0 : index
    %5 = vector.load %arg4[%c0_6, %c0_7] : memref<16x256xf32, #tpu.memory_space<vmem>>, vector<16x256xf32>
    tpu.vector_store %arg4[%c0_6, %c0_7], %4 {strides = array<i32>} : memref<16x256xf32, #tpu.memory_space<vmem>>, vector<16x256xf32>,
    return
  }
  func.func @transform_0(%arg0: i32) -> (i32, i32) {
    %c0_i32 = arith.constant 0 : i32
    %c0_i32_0 = arith.constant 0 : i32
    return %arg0, %c0_i32 : i32, i32
  }
  func.func @transform_1(%arg0: i32) -> (i32, i32) {
    %c0_i32 = arith.constant 0 : i32
    %c0_i32_0 = arith.constant 0 : i32
    %c0_i32_1 = arith.constant 0 : i32
    return %c0_i32, %c0_i32_0 : i32, i32
  }
  func.func @transform_2(%arg0: i32) -> (i32, i32) {
    %c0_i32 = arith.constant 0 : i32
    %c0_i32_0 = arith.constant 0 : i32
    %c0_i32_1 = arith.constant 0 : i32
    return %c0_i32, %c0_i32_0 : i32, i32
  }
  func.func @transform_3(%arg0: i32) -> (i32, i32) {
    %c0_i32 = arith.constant 0 : i32
    %c0_i32_0 = arith.constant 0 : i32
    return %arg0, %c0_i32 : i32, i32
  }
}

</mosaic_0001>

<bundles_post_ra>
// kernel: tpu_custom_call.1
= control target key start
LH: loop header
LB: loop body
LE: loop exit
PB: predicated region body
PF: predicated region fallthrough
CT: control target
= control target key end

     0   :  { %8 = vsyncpa [#allocation3], 0  ;;  %s1166_s0 = inlined_call_operand.hbm [shape: f32[32,256], index: 0, kind: input, shape index: {}]   ;;  %s1167_s1 = inlined_call_operand.hbm [shape: f32[16,16], index: 1, kind: input, shape index: {}]   ;;  %s1168_s2 = inlined_call_operand.hbm [shape: f32[256,256], index: 2, kind: input, shape index: {}]   ;;  %s1169_s3 = inlined_call_operand.hbm [shape: f32[32,256], index: 3, kind: output, shape index: {}]  }
   0x1   :  { %10 = vsyncpa [#allocation3 + $0x1], 0 }
   0x2   :  { %11 = vsyncpa [#allocation6], 0 }
   0x3   :  { %12 = vsyncpa [#allocation4], 0 }
   0x4   :  { %14 = vsyncpa [#allocation4 + $0x1], 0  ;;  %s920_s12 = smov 0   ;;  %s922_s13 = smov 0  }
   0x5   :  { %s924_s14 = smov 0   ;;  %s926_s15 = smov 0  }
   0x6 LB: > { %s941_s16 = sadd.s32 4294967295, %s887_s15   ;;  %s563_s17 = sadd.s32 4294967294, %s887_s15   ;;  %s887_s15 = sphi %s926_s15, %s1189_s15   ;;  %s883_s14 = sphi %s924_s14, %s1188_s14   ;;  %s879_s13 = sphi %s922_s13, %s1187_s13   ;;  %s875_s12 = sphi %s920_s12, %s1186_s12  }
   0x7   : > { %p40_p0 = scmp.ne.s32.totalorder %s879_s13, %s875_s12  ;;  %p1170_p1 = scmp.eq.s32.totalorder %s941_s16, 0 }
   0x8   : > { %p112_p3 = scmp.eq.s32.totalorder %s563_s17, 1  ;;  %p564_p5 = scmp.ge.s32.totalorder %s887_s15, 1 }
   0x9   : > { %p950_p4 = por %p1170_p1, %p40_p0  ;;  %p119_p7 = scmp.lt.s32.totalorder %s887_s15, 3 }
   0xa   : > { %p955_p6 = por %p112_p3, %p40_p0  ;;  %s889_s21 = smov [#allocation5]  }
   0xb   : > { %s1173_s18 = scalar_select %p950_p4, 1, 0 }
   0xc   : > { %s1174_s19 = scalar_select %p955_p6, 1, 0 }
   0xd   : > { %p960_p8 = pnand %p564_p5, %p119_p7  ;;  %s131_s22 = sshll.u32 %s889_s21, 4  ;;  %s964_s22 = int_to_ptr.vmem [resolvable:$true] %s131_s22 }
   0xe   : > { %s890_s24 = smov [#allocation7]   ;;  %s731_s28 = scalar_lea.hbm %s1167_s1, 256 }
   0xf   : > { %p669_p9 = pneg %p960_p8  ;;  %s144_s25 = sshll.u32 %s890_s24, 4  ;;  %s975_s25 = int_to_ptr.vmem [resolvable:$true] %s144_s25 }
  0x10   : > { %p732_p12 = scmp.ne.s32.totalorder %s1167_s1, %s731_s28  ;;  %p738_p5 = scmp.lt.u32.totalorder %s731_s28, %s1167_s1 }
  0x11   : > { %p971_p11 = pnand %p669_p9, %p1170_p1 }
  0x13   : > { %p733_p13 = pneg %p971_p11 }
  0x15   : > { %p734_p0 = pnand %p733_p13, %p732_p12 }
  0x17   : > { %p735_p3 = pneg %p734_p0 }
  0x19   : > { %p740_p7 = pnand %p738_p5, %p735_p3 }
  0x1b   : > { %743 = shalt.err (!%p740_p7)
}
  0x1c   : > { %s744_s6 = scalar_lea.vmem %s964_s22, 256  ;;  %p752_p2 = scmp.lt.s32.totalorder %s964_s22, %s964_s22 }
  0x1d   : > { %p745_p9 = scmp.ne.s32.totalorder %s964_s22, %s744_s6  ;;  %p753_p12 = scmp.lt.s32.totalorder %s744_s6, %s744_s6 }
  0x1f   : > { %p747_p10 = pnand %p745_p9, %p733_p13  ;;  %p754_p0 = por %p753_p12, %p752_p2 }
  0x21   : > { %p748_p1 = pneg %p747_p10 }
  0x23   : > { %p755_p6 = pnand %p754_p0, %p748_p1 }
  0x25   : > { %758 = shalt.err (!%p755_p6)
}
  0x26   : > { %s891_s7 = smov 128   ;;  %s892_s8 = smov 8  }
  0x27   : > { %672 = dma.hbm_to_vmem [thread:$0]  (!%p971_p11), %s1167_s1, 256, %s964_s22, [#allocation6], %s891_s7, %s891_s7, %s892_s8  }
  0x28   : > { %s759_s21 = scalar_lea.hbm %s1168_s2, 8192 }
  0x29   : > { %p760_p2 = scmp.ne.s32.totalorder %s1168_s2, %s759_s21  ;;  %p766_p10 = scmp.lt.u32.totalorder %s759_s21, %s1168_s2 }
  0x2b   : > { %p762_p1 = pnand %p760_p2, %p733_p13 }
  0x2d   : > { %p763_p6 = pneg %p762_p1 }
  0x2f   : > { %p768_p3 = pnand %p766_p10, %p763_p6 }
  0x31   : > { %771 = shalt.err (!%p768_p3)
}
  0x32   : > { %s772_s22 = scalar_lea.vmem %s975_s25, 8192  ;;  %p780_p12 = scmp.lt.s32.totalorder %s975_s25, %s975_s25 }
  0x33   : > { %p773_p5 = scmp.ne.s32.totalorder %s975_s25, %s772_s22  ;;  %p781_p0 = scmp.lt.s32.totalorder %s772_s22, %s772_s22 }
  0x35   : > { %p775_p7 = pnand %p773_p5, %p733_p13  ;;  %p782_p2 = por %p781_p0, %p780_p12 }
  0x37   : > { %p776_p9 = pneg %p775_p7 }
  0x39   : > { %p783_p1 = pnand %p782_p2, %p776_p9 }
  0x3b   : > { %786 = shalt.err (!%p783_p1)
}
  0x3c   : > { %s893_s29 = smov 256   ;;  %s894_s30 = smov 16  }
  0x3d   : > { %675 = dma.hbm_to_vmem [thread:$0]  (!%p971_p11), %s1168_s2, 8192, %s975_s25, [#allocation6], %s893_s29, %s893_s29, %s894_s30  }
  0x3e   : > { %s1033_s6 = sadd.s32 1, %s887_s15   ;;  %s27_s8 = sadd.s32 1, %s883_s14 }
  0x3f   : > { %s24_s7 = ssub.s32 %s887_s15, %s1033_s6  ;;  %p34_p6 = scmp.ne.s32.totalorder %s883_s14, %s879_s13 }
  0x40   : > { %p25_p13 = scmp.eq.s32.totalorder %s24_s7, 0  ;;  %p35_p10 = scmp.eq.s32.totalorder %s887_s15, 0 }
  0x41   : > { %p1177_p5 = scmp.eq.s32.totalorder %s941_s16, 1  ;;  %p686_p9 = scmp.lt.s32.totalorder %s887_s15, 2 }
  0x42   : > { %s1042_s9 = scalar_select %p25_p13, %s883_s14, %s27_s8  }
  0x43   : > { %p36_p3 = por %p35_p10, %p34_p6  ;;  %p1046_p7 = por %p1177_p5, %p34_p6 }
  0x44   : > { %s158_s10 = sand.u32 1, %s883_s14   ;;  %s586_s25 = sshll.u32 %s887_s15, 9 }
  0x45   : > { %s1178_s23 = scalar_select %p1046_p7, 1, 0 }
  0x46   : > { %s568_s11 = sshll.u32 %s158_s10, 5  ;;  %s1056_s24 = scalar_lea.hbm %s1166_s0, %s586_s25 }
  0x47   : > { %s162_s26 = scalar_lea.vmem [#allocation2], %s568_s11  ;;  %p1060_p11 = pnand %p686_p9, %p36_p3 }
  0x48   : > { %s170_s27 = sshll.u32 %s162_s26, 4  ;;  %s1064_s22 = scalar_lea.sflag [#allocation3], %s158_s10  ;;  %s1058_s27 = int_to_ptr.vmem [resolvable:$true] %s170_s27 }
  0x49   : > { %s787_s4 = scalar_lea.hbm %s1056_s24, 512  ;;  %p789_p0 = pneg %p1060_p11 }
  0x4a   : > { %p788_p12 = scmp.ne.s32.totalorder %s1056_s24, %s787_s4  ;;  %s792_s8 = scalar_lea.hbm %s1166_s0, 1024 }
  0x4b   : > { %p793_p13 = scmp.lt.u32.totalorder %s1056_s24, %s1166_s0  ;;  %p794_p6 = scmp.lt.u32.totalorder %s792_s8, %s787_s4 }
  0x4c   : > { %p790_p2 = pnand %p789_p0, %p788_p12  ;;  %p796_p3 = scmp.lt.u32.totalorder %s787_s4, %s1056_s24 }
  0x4d   : > { %p795_p10 = por %p794_p6, %p793_p13 }
  0x4e   : > { %p791_p1 = pneg %p790_p2 }
  0x4f   : > { %p797_p5 = por %p796_p3, %p795_p10 }
  0x51   : > { %p798_p9 = pnand %p797_p5, %p791_p1 }
  0x53   : > { %801 = shalt.err (!%p798_p9)
}
  0x54   : > { %s802_s10 = scalar_lea.vmem %s1058_s27, 512  ;;  %s895_s17 = smov [#allocation2]  }
  0x55   : > { %p803_p12 = scmp.ne.s32.totalorder %s1058_s27, %s802_s10  ;;  %s807_s21 = sshll.u32 %s895_s17, 4  ;;  %s808_s21 = int_to_ptr.vmem [resolvable:$false] %s807_s21 }
  0x56   : > { %s809_s26 = scalar_lea.vmem %s808_s21, 1024  ;;  %p810_p4 = scmp.lt.s32.totalorder %s1058_s27, %s808_s21 }
  0x57   : > { %p805_p2 = pnand %p803_p12, %p789_p0  ;;  %p811_p13 = scmp.lt.s32.totalorder %s809_s26, %s802_s10 }
  0x59   : > { %p806_p7 = pneg %p805_p2  ;;  %p812_p6 = por %p811_p13, %p810_p4 }
  0x5b   : > { %p813_p10 = pnand %p812_p6, %p806_p7 }
  0x5d   : > { %816 = shalt.err (!%p813_p10)
}
  0x5e   : > { %679 = dma.hbm_to_vmem [thread:$0]  (!%p1060_p11), %s1056_s24, 512, %s1058_s27, %s1064_s22, %s893_s29, %s893_s29, %s894_s30  }
  0x5f   : > { %182 = sbr.rel (%p960_p8) target bundleno = 559 (0x22f), region = 32  ;;  %s1098_s4 = sand.u32 (!%p960_p8), 1, %s879_s13  }
  0x60   : > { %s573_s5 = sshll.u32 (!%p960_p8), %s1098_s4, 5  ;;  %s185_s7 = scalar_lea.sflag (!%p960_p8), [#allocation3], %s1098_s4 }
  0x61   : > { %s188_s28 = scalar_lea.vmem (!%p960_p8), [#allocation2], %s573_s5  ;;  %p1180_p4 = scmp.ne.s32.totalorder (!%p960_p8), %s1173_s18, 0 }
  0x66   : > { %862 = dma.done.wait (%p1180_p4), %s185_s7, 512  }
  0x67   : > { %864 = vsyncadd (%p1180_p4), %s185_s7, 4294966784  ;;  %p1181_p7 = scmp.eq.s32.totalorder %s941_s16, 0 }
  0x69   : > { %866 = dma.done.wait (%p1181_p7), [#allocation6], 8448   ;;  %p1182_p8 = pmov %p1181_p7 }
  0x6a   : > { %v896_v0 = vmov 0.0   ;;  %v224_v1 = vld [vmem:[%s188_s28 + $0x8] sm:$0xff]  ;;  %v226_v2 = vld [vmem:[%s188_s28 + $0x18] sm:$0xff]  ;;  %v223_v3 = vld [vmem:[%s188_s28] sm:$0xff]  ;;  %vm227_vm0 = vcmask 130048   ;;  %s218_s18 = scalar_lea.vmem [#allocation8], %s573_s5 }
  0x6b   : > { %868 = vsyncadd (%p1182_p8), [#allocation6], 4294958848  ;;  %298 = vmatprep.mubr.f32.mxu0 %v896_v0  ;;  %v589_v4 = vpack.c.bf16 %v226_v2, %v224_v1  ;;  %v225_v5 = vld [vmem:[%s188_s28 + $0x10] sm:$0xff]  ;;  %v221_v7 = vld [vmem:[#allocation5] sm:$0xff]  ;;  %s471_s20 = sshll.u32 %s218_s18, 4  ;;  %s588_s29 = sshll.u32 %s941_s16, 9  ;;  %s1117_s20 = int_to_ptr.vmem [resolvable:$true] %s471_s20 }
  0x6c   : > { %v591_v6 = vpack.c.bf16 %v225_v5, %v223_v3  ;;  %v312_v8 = vld [vmem:[#allocation7 + $0x8] sm:$0xff]  ;;  %v314_v9 = vld [vmem:[#allocation7 + $0x18] sm:$0xff]  ;;  %v311_v10 = vld [vmem:[#allocation7] sm:$0xff]  ;;  %s1122_s27 = scalar_lea.hbm %s1169_s3, %s588_s29  ;;  %s457_s22 = scalar_lea.sflag [#allocation4], %s1098_s4 }
  0x6d   : > { %590 = vmatprep.subr.bf16.mxu0 %v589_v4  ;;  %v593_v11 = vpack.c.bf16 %v314_v9, %v312_v8  ;;  %v313_v12 = vld [vmem:[#allocation7 + $0x10] sm:$0xff]  ;;  %v316_v13 = vld [vmem:[#allocation7 + $0x28] sm:$0xff]  ;;  %v318_v14 = vld [vmem:[#allocation7 + $0x38] sm:$0xff]  ;;  %s817_s8 = scalar_lea.vmem %s1117_s20, 512  ;;  %p1183_p0 = scmp.ne.s32.totalorder %s1178_s23, 0 }
  0x6e   : > { %592 = vmatpush1.bf16.msra.mxu0 %v591_v6  ;;  %v595_v15 = vpack.c.bf16 %v313_v12, %v311_v10  ;;  %v597_v16 = vpack.c.bf16 %v318_v14, %v316_v13  ;;  %v315_v17 = vld [vmem:[#allocation7 + $0x20] sm:$0xff]  ;;  %v317_v18 = vld [vmem:[#allocation7 + $0x30] sm:$0xff]  ;;  %v320_v19 = vld [vmem:[#allocation7 + $0x48] sm:$0xff]  ;;  %p818_p11 = scmp.ne.s32.totalorder %s1117_s20, %s817_s8  ;;  %s897_s16 = smov [#allocation8]  }
  0x6f   : > { %594 = vmatprep.subr.bf16.mxu1 %v593_v11  ;;  %v322_v20 = vld [vmem:[#allocation7 + $0x58] sm:$0xff]  ;;  %v599_v21 = vpack.c.bf16 %v317_v18, %v315_v17  ;;  %v319_v23 = vld [vmem:[#allocation7 + $0x40] sm:$0xff]  ;;  %v321_v24 = vld [vmem:[#allocation7 + $0x50] sm:$0xff]  ;;  %s821_s11 = sshll.u32 %s897_s16, 4  ;;  %s822_s11 = int_to_ptr.vmem [resolvable:$false] %s821_s11 }
  0x70   : > { %596 = vmatpush1.bf16.msra.mxu1 %v595_v15  ;;  %v601_v22 = vpack.c.bf16 %v322_v20, %v320_v19  ;;  %v222_v25 = vld [vmem:[#allocation5 + $0x8] sm:$0xff]  ;;  %v324_v26 = vld [vmem:[#allocation7 + $0x68] sm:$0xff]  ;;  %v603_v28 = vpack.c.bf16 %v321_v24, %v319_v23  ;;  %v323_v30 = vld [vmem:[#allocation7 + $0x60] sm:$0xff]  ;;  %p819_p1 = pnand %p818_p11, %p1183_p0  ;;  %s823_s25 = scalar_lea.vmem %s822_s11, 1024 }
  0x71   : > { %577 = vmatmul.mubr.msk.f32.vlgmr.msra.gmra.mrb[0].mxu0 %vm227_vm0, %v221_v7  ;;  %598 = vmatprep.subr.bf16.mxu1 %v597_v16  ;;  %v326_v27 = vld [vmem:[#allocation7 + $0x78] sm:$0xff]  ;;  %v325_v31 = vld [vmem:[#allocation7 + $0x70] sm:$0xff]  ;;  %v328_v32 = vld [vmem:[#allocation7 + $0x88] sm:$0xff]  ;;  %p824_p5 = scmp.lt.s32.totalorder %s1117_s20, %s822_s11  ;;  %p825_p9 = scmp.lt.s32.totalorder %s823_s25, %s817_s8 }
  0x72   : > { %304 = vmatprep.mubr.f32.mxu0 %v896_v0  ;;  %v605_v29 = vpack.c.bf16 %v326_v27, %v324_v26  ;;  %v330_v33 = vld [vmem:[#allocation7 + $0x98] sm:$0xff]  ;;  %v607_v34 = vpack.c.bf16 %v325_v31, %v323_v30  ;;  %v327_v36 = vld [vmem:[#allocation7 + $0x80] sm:$0xff]  ;;  %v329_v37 = vld [vmem:[#allocation7 + $0x90] sm:$0xff]  ;;  %p820_p3 = pneg %p819_p1 }
  0x73   : > { %v609_v35 = vpack.c.bf16 %v330_v33, %v328_v32  ;;  %v332_v38 = vld [vmem:[#allocation7 + $0xa8] sm:$0xff]  ;;  %v334_v39 = vld [vmem:[#allocation7 + $0xb8] sm:$0xff]  ;;  %v611_v40 = vpack.c.bf16 %v329_v37, %v327_v36  ;;  %v331_v42 = vld [vmem:[#allocation7 + $0xa0] sm:$0xff]  ;;  %p826_p12 = por %p825_p9, %p824_p5 }
  0x74   : > { %600 = vmatpush1.bf16.msra.mxu1 %v599_v21  ;;  %v613_v41 = vpack.c.bf16 %v334_v39, %v332_v38  ;;  %v333_v43 = vld [vmem:[#allocation7 + $0xb0] sm:$0xff]  ;;  %v336_v44 = vld [vmem:[#allocation7 + $0xc8] sm:$0xff]  ;;  %v338_v45 = vld [vmem:[#allocation7 + $0xd8] sm:$0xff] }
  0x75   : > { %578 = vmatmul.mubr.msk.f32.gmra.mrb[2].mxu0 %vm227_vm0, %v222_v25  ;;  %602 = vmatprep.subr.bf16.mxu1 %v601_v22  ;;  %v615_v46 = vpack.c.bf16 %v333_v43, %v331_v42  ;;  %v617_v47 = vpack.c.bf16 %v338_v45, %v336_v44  ;;  %v335_v48 = vld [vmem:[#allocation7 + $0xc0] sm:$0xff]  ;;  %v337_v49 = vld [vmem:[#allocation7 + $0xd0] sm:$0xff]  ;;  %v340_v50 = vld [vmem:[#allocation7 + $0xe8] sm:$0xff]  ;;  %p827_p2 = pnand %p826_p12, %p820_p3 }
  0x76   : > { %v342_v51 = vld [vmem:[#allocation7 + $0xf8] sm:$0xff]  ;;  %v619_v52 = vpack.c.bf16 %v337_v49, %v335_v48  ;;  %v339_v54 = vld [vmem:[#allocation7 + $0xe0] sm:$0xff]  ;;  %v341_v55 = vld [vmem:[#allocation7 + $0xf0] sm:$0xff] }
  0x77   : > { %v621_v53 = vpack.c.bf16 %v342_v51, %v340_v50  ;;  %v344_v56 = vld [vmem:[#allocation7 + $0x108] sm:$0xff]  ;;  %v346_v57 = vld [vmem:[#allocation7 + $0x118] sm:$0xff]  ;;  %v623_v58 = vpack.c.bf16 %v341_v55, %v339_v54  ;;  %v343_v60 = vld [vmem:[#allocation7 + $0x100] sm:$0xff] }
  0x78   : > { %604 = vmatpush1.bf16.msra.mxu1 %v603_v28  ;;  %v625_v59 = vpack.c.bf16 %v346_v57, %v344_v56  ;;  %v345_v61 = vld [vmem:[#allocation7 + $0x110] sm:$0xff]  ;;  %v348_v62 = vld [vmem:[#allocation7 + $0x128] sm:$0xff]  ;;  %v350_v63 = vld [vmem:[#allocation7 + $0x138] sm:$0xff] }
  0x79   : > { %606 = vmatprep.subr.bf16.mxu1 %v605_v29  ;;  %v627_v0 = vpack.c.bf16 %v345_v61, %v343_v60  ;;  %v629_v1 = vpack.c.bf16 %v350_v63, %v348_v62  ;;  %v347_v2 = vld [vmem:[#allocation7 + $0x120] sm:$0xff]  ;;  %v349_v3 = vld [vmem:[#allocation7 + $0x130] sm:$0xff]  ;;  %v352_v4 = vld [vmem:[#allocation7 + $0x148] sm:$0xff] }
  0x7a   : > { %v354_v5 = vld [vmem:[#allocation7 + $0x158] sm:$0xff]  ;;  %v631_v6 = vpack.c.bf16 %v349_v3, %v347_v2  ;;  %v351_v8 = vld [vmem:[#allocation7 + $0x140] sm:$0xff]  ;;  %v353_v9 = vld [vmem:[#allocation7 + $0x150] sm:$0xff] }
  0x7b   : > { %v633_v7 = vpack.c.bf16 %v354_v5, %v352_v4  ;;  %v356_v10 = vld [vmem:[#allocation7 + $0x168] sm:$0xff]  ;;  %v358_v11 = vld [vmem:[#allocation7 + $0x178] sm:$0xff]  ;;  %v635_v12 = vpack.c.bf16 %v353_v9, %v351_v8  ;;  %v355_v14 = vld [vmem:[#allocation7 + $0x160] sm:$0xff] }
  0x7c   : > { %608 = vmatpush1.bf16.msra.mxu1 %v607_v34  ;;  %v637_v13 = vpack.c.bf16 %v358_v11, %v356_v10  ;;  %v357_v15 = vld [vmem:[#allocation7 + $0x170] sm:$0xff]  ;;  %v360_v16 = vld [vmem:[#allocation7 + $0x188] sm:$0xff]  ;;  %v362_v17 = vld [vmem:[#allocation7 + $0x198] sm:$0xff] }
  0x7d   : > { %610 = vmatprep.subr.bf16.mxu1 %v609_v35  ;;  %v639_v18 = vpack.c.bf16 %v357_v15, %v355_v14  ;;  %v641_v19 = vpack.c.bf16 %v362_v17, %v360_v16  ;;  %v359_v20 = vld [vmem:[#allocation7 + $0x180] sm:$0xff]  ;;  %v361_v21 = vld [vmem:[#allocation7 + $0x190] sm:$0xff]  ;;  %v364_v22 = vld [vmem:[#allocation7 + $0x1a8] sm:$0xff] }
  0x7e   : > { %v366_v23 = vld [vmem:[#allocation7 + $0x1b8] sm:$0xff]  ;;  %v643_v24 = vpack.c.bf16 %v361_v21, %v359_v20  ;;  %v363_v26 = vld [vmem:[#allocation7 + $0x1a0] sm:$0xff]  ;;  %v365_v27 = vld [vmem:[#allocation7 + $0x1b0] sm:$0xff] }
  0x7f   : > { %v645_v25 = vpack.c.bf16 %v366_v23, %v364_v22  ;;  %v368_v28 = vld [vmem:[#allocation7 + $0x1c8] sm:$0xff]  ;;  %v370_v29 = vld [vmem:[#allocation7 + $0x1d8] sm:$0xff]  ;;  %v647_v30 = vpack.c.bf16 %v365_v27, %v363_v26  ;;  %v367_v32 = vld [vmem:[#allocation7 + $0x1c0] sm:$0xff] }
  0x80   : > { %612 = vmatpush1.bf16.msra.mxu1 %v611_v40  ;;  %v649_v31 = vpack.c.bf16 %v370_v29, %v368_v28  ;;  %v369_v33 = vld [vmem:[#allocation7 + $0x1d0] sm:$0xff]  ;;  %v372_v34 = vld [vmem:[#allocation7 + $0x1e8] sm:$0xff]  ;;  %v374_v35 = vld [vmem:[#allocation7 + $0x1f8] sm:$0xff] }
  0x81   : > { %614 = vmatprep.subr.bf16.mxu1 %v613_v41  ;;  %v651_v36 = vpack.c.bf16 %v369_v33, %v367_v32  ;;  %v653_v37 = vpack.c.bf16 %v374_v35, %v372_v34  ;;  %v371_v38 = vld [vmem:[#allocation7 + $0x1e0] sm:$0xff]  ;;  %v373_v39 = vld [vmem:[#allocation7 + $0x1f0] sm:$0xff] }
  0x82   : > { %v655_v40 = vpack.c.bf16 %v373_v39, %v371_v38 }
  0x84   : > { %616 = vmatpush1.bf16.msra.mxu1 %v615_v46 }
  0x85   : > { %618 = vmatprep.subr.bf16.mxu1 %v617_v47 }
  0x88   : > { %620 = vmatpush1.bf16.msra.mxu1 %v619_v52 }
  0x89   : > { %622 = vmatprep.subr.bf16.mxu1 %v621_v53 }
  0x8c   : > { %624 = vmatpush1.bf16.msra.mxu1 %v623_v58 }
  0x8d   : > { %626 = vmatprep.subr.bf16.mxu1 %v625_v59 }
  0x90   : > { %628 = vmatpush1.bf16.msra.mxu1 %v627_v0 }
  0x91   : > { %630 = vmatprep.subr.bf16.mxu1 %v629_v1 }
  0x94   : > { %632 = vmatpush1.bf16.msra.mxu1 %v631_v6 }
  0x95   : > { %634 = vmatprep.subr.bf16.mxu1 %v633_v7 }
  0x98   : > { %636 = vmatpush1.bf16.msra.mxu1 %v635_v12 }
  0x99   : > { %638 = vmatprep.subr.bf16.mxu1 %v637_v13 }
  0x9c   : > { %640 = vmatpush1.bf16.msra.mxu1 %v639_v18 }
  0x9d   : > { %642 = vmatprep.subr.bf16.mxu1 %v641_v19 }
  0xa0   : > { %644 = vmatpush1.bf16.msra.mxu1 %v643_v24 }
  0xa1   : > { %646 = vmatprep.subr.bf16.mxu1 %v645_v25 }
  0xa4   : > { %648 = vmatpush1.bf16.msra.mxu1 %v647_v30 }
  0xa5   : > { %650 = vmatprep.subr.bf16.mxu1 %v649_v31 }
  0xa8   : > { %652 = vmatpush1.bf16.msra.mxu1 %v651_v36 }
  0xa9   : > { %654 = vmatprep.subr.bf16.mxu1 %v653_v37 }
  0xac   : > { %656 = vmatpush1.bf16.msra.mxu1 %v655_v40 }
 0x144   : > { %v300_v41 = vpop.f32.mrb[0].mxu0 }
 0x145   : > { %v302_v42 = vpop.f32.mrb[1].mxu0 }
 0x146   : > { %439 = vmatprep.mubr.f32.mxu1 %v302_v42 }
 0x147   : > { %440 = vmatmul.mubr.f32.vlgmr.msra.gmra.mrb[0].mxu1 %v300_v41 }
 0x148   : > { %v306_v43 = vpop.f32.mrb[2].mxu0 }
 0x149   : > { %v308_v44 = vpop.f32.mrb[3].mxu0 }
 0x14a   : > { %445 = vmatprep.mubr.f32.mxu1 %v308_v44 }
 0x14b   : > { %446 = vmatmul.mubr.f32.gmra.mrb[2].mxu1 %v306_v43 }
 0x21a   : > { %v441_v45 = vpop.f32.mrb[0].mxu1 }
 0x21b   : > { %452 = vst [vmem:[%s218_s18] sm:$0xff] %v441_v45  ;;  %v443_v46 = vpop.f32.mrb[1].mxu1 }
 0x21c   : > { %453 = vst [vmem:[%s218_s18 + $0x8] sm:$0xff] %v443_v46 }
 0x21e   : > { %v447_v47 = vpop.f32.mrb[2].mxu1 }
 0x21f   : > { %454 = vst [vmem:[%s218_s18 + $0x10] sm:$0xff] %v447_v47  ;;  %v449_v48 = vpop.f32.mrb[3].mxu1 }
 0x220   : > { %455 = vst [vmem:[%s218_s18 + $0x18] sm:$0xff] %v449_v48 }
 0x221   : > { %830 = shalt.err (!%p827_p2)
}
 0x222   : > { %s831_s10 = scalar_lea.hbm %s1122_s27, 512  ;;  %s835_s26 = scalar_lea.hbm %s1169_s3, 1024 }
 0x223   : > { %p832_p13 = scmp.ne.s32.totalorder %s1122_s27, %s831_s10  ;;  %p836_p4 = scmp.lt.u32.totalorder %s1122_s27, %s1169_s3 }
 0x224   : > { %p837_p7 = scmp.lt.u32.totalorder %s835_s26, %s831_s10  ;;  %p839_p11 = scmp.lt.u32.totalorder %s831_s10, %s1122_s27 }
 0x225   : > { %p833_p6 = pnand %p832_p13, %p1183_p0 }
 0x226   : > { %p838_p8 = por %p837_p7, %p836_p4 }
 0x227   : > { %p834_p10 = pneg %p833_p6 }
 0x228   : > { %p840_p1 = por %p839_p11, %p838_p8 }
 0x22a   : > { %p841_p3 = pnand %p840_p1, %p834_p10 }
 0x22c   : > { %844 = shalt.err (!%p841_p3)
}
 0x22d   : > { %s898_s28 = smov 256   ;;  %s899_s18 = smov 16  }
 0x22e   : > { %667 = dma.vmem_to_hbm [thread:$0]  (%p1183_p0), %s1117_s20, 512, %s1122_s27, %s457_s22, %s898_s28, %s898_s28, %s899_s18  }
 0x22f PF: > { %s486_s29 = sand.u32 1, %s875_s12   ;;  %p1184_p5 = scmp.ne.s32.totalorder %s1174_s19, 0 }
 0x230   : > { %p1185_p9 = scmp.ge.s32.totalorder %s887_s15, 2  ;;  %s487_s30 = scalar_lea.sflag [#allocation4], %s486_s29 }
 0x232   : > { %p681_p12 = pnand %p1185_p9, %p1184_p5 }
 0x234   : > { %870 = dma.done.wait (!%p681_p12), %s487_s30, 512  }
 0x235   : > { %872 = vsyncadd (!%p681_p12), %s487_s30, 4294966784  ;;  %p17_p2 = scmp.ge.s32.totalorder %s1033_s6, 4   ;;  %s1186_s12 = smov %s879_s13 }
 0x236   : > { %s1187_s13 = smov %s883_s14  ;;  %s1188_s14 = smov %s1042_s9 }
 0x237   : > { %s1189_s15 = smov %s1033_s6  ;;  %19 = sbr.rel (!%p17_p2) target bundleno = 6 (0x6), region = 85 }
 0x23e   :  { %492 = vsyncpa [#allocation3], 1 }
 0x23f   :  { %494 = vsyncpa [#allocation3 + $0x1], 1 }
 0x240   :  { %495 = vsyncpa [#allocation6], 1 }
 0x241   :  { %496 = vsyncpa [#allocation4], 1 }
 0x242   :  { %498 = vsyncpa [#allocation4 + $0x1], 1 }

</bundles_post_ra>
